<compile_context>
chip_gen: v7x
topology: tpu7x:2x2x1
jax: 0.10.0
libtpu: 0.0.40
codegen_flags: <defaults>
</compile_context>

<pallas_src>
import functools

import jax
import jax.numpy as jnp
from jax.experimental import pallas as pl
from jax.experimental.pallas import tpu as pltpu

_LANE = 128
_LANE_TILE_CAP = 2048                    # lanes per block (multiple of 128)
_VMEM_BLOCK_BUDGET = 12 * 1024 * 1024    # double-buffered in+out block budget
_VMEM_LIMIT = 32 * 1024 * 1024           # scoped-VMEM limit handed to Mosaic
_SMALL_BYTES = 1 << 20                   # below this, plain XLA slicing wins


def _sublane_pack(itemsize: int) -> int:
    """Sublane packing factor: 8 for 32-bit, 16 for 16-bit, 32 for 8-bit."""
    return 8 * max(1, 4 // itemsize)


def _copy_kernel(x_ref, o_ref):
    """Pure block copy: (r_tile, l_tile) in -> (r_tile, l_tile) out."""
    o_ref[...] = x_ref[...]


def _prefix_kernel(x_ref, o_ref, *, out_len):
    """Short-sequence path: (r_tile, l_in) in -> (r_tile, l_out) out."""
    o_ref[...] = x_ref[:, :out_len]


def _row_tile(rows, per_row_block_bytes, pack):
    """Largest pack-multiple row tile whose pipelined blocks fit the budget."""
    max_r = max(1, _VMEM_BLOCK_BUDGET // per_row_block_bytes)
    if rows < pack:
        return rows                       # full-extent block is always legal
    r = (min(max_r, rows) // pack) * pack
    return max(pack, r)                   # <= rows, multiple of pack


def chomp1d(x, chomp_size, *, force_pallas=False):
    """x: (batch, channels, seq_len) -> x[:, :, :seq_len - chomp_size]."""
    batch, channels, l_in = x.shape
    # NOTE: PyTorch's x[:, :, :-0] returns an empty tensor; a zero chomp is a
    # degenerate case in TCN usage, so we reject it explicitly.
    assert 0 < chomp_size < l_in, "chomp_size must be in (0, seq_len)"
    l_out = l_in - chomp_size
    rows = batch * channels
    itemsize = x.dtype.itemsize
    pack = _sublane_pack(itemsize)

    # Free view (x is dense): rows -> sublane axis, sequence -> lane axis.
    x2d = x.reshape(rows, l_in)

    # Small-problem fast path: launch overhead dominates tiny copies.
    if not force_pallas and rows * l_in * itemsize < _SMALL_BYTES:
        return x2d[:, :l_out].reshape(batch, channels, l_out)

    if l_out >= _LANE:
        # 2-D (row, lane) grid.  Same block shape + index_map on both sides,
        # so the input DMA never fetches the chomped tail past the last lane
        # block, and boundary blocks (row or lane) are masked by Pallas.
        l_tile = min(_LANE_TILE_CAP, (l_out // _LANE) * _LANE)
        per_row = 2 * 2 * l_tile * itemsize          # in+out, double-buffered
        r_tile = _row_tile(rows, per_row, pack)
        grid = (pl.cdiv(rows, r_tile), pl.cdiv(l_out, l_tile))
        out2d = pl.pallas_call(
            _copy_kernel,
            grid=grid,
            in_specs=[pl.BlockSpec((r_tile, l_tile), lambda i, j: (i, j))],
            out_specs=pl.BlockSpec((r_tile, l_tile), lambda i, j: (i, j)),
            out_shape=jax.ShapeDtypeStruct((rows, l_out), x.dtype),
            compiler_params=pltpu.CompilerParams(
                dimension_semantics=("parallel", "parallel"),
                vmem_limit_bytes=_VMEM_LIMIT,
            ),
        )(x2d)
    else:
        # Short sequences: full lane extent on both sides (legal for any
        # length); the chomp is a static in-kernel prefix slice and the read
        # tail is at most chomp_size < 128 lanes per row.
        per_row = 2 * (l_in + l_out) * itemsize
        r_tile = _row_tile(rows, per_row, pack)
        grid = (pl.cdiv(rows, r_tile),)
        out2d = pl.pallas_call(
            functools.partial(_prefix_kernel, out_len=l_out),
            grid=grid,
            in_specs=[pl.BlockSpec((r_tile, l_in), lambda i: (i, 0))],
            out_specs=pl.BlockSpec((r_tile, l_out), lambda i: (i, 0)),
            out_shape=jax.ShapeDtypeStruct((rows, l_out), x.dtype),
            compiler_params=pltpu.CompilerParams(
                dimension_semantics=("parallel",),
                vmem_limit_bytes=_VMEM_LIMIT,
            ),
        )(x2d)

    # .contiguous() in PyTorch is a layout no-op here; JAX results are dense.
    return out2d.reshape(batch, channels, l_out)


if __name__ == "__main__":
    key = jax.random.PRNGKey(0)
    k1, k2 = jax.random.split(key, 2)

    # 1) Module-sized shapes (batch=2, channels=4, seq_len=16): fast path.
    b, c, s, ch = 2, 4, 16, 2
    x_small = jax.random.normal(k1, (b, c, s), dtype=jnp.float32)
    ref_small = x_small[:, :, : s - ch]
    out_small = jax.block_until_ready(chomp1d(x_small, ch))
    assert out_small.shape == (b, c, s - ch), out_small.shape
    assert jnp.array_equal(out_small, ref_small), "fast-path mismatch"

    # 2) Same small shape forced through the short-sequence Pallas kernel.
    out_small_k = jax.block_until_ready(chomp1d(x_small, ch, force_pallas=True))
    assert jnp.array_equal(out_small_k, ref_small), "short-seq kernel mismatch"

    # 3) Modest longer sequence exercising the 2-D lane-tiled kernel
    #    (l_out >= 128, partial lane block, bf16 sublane packing).
    b2, c2, s2, ch2 = 2, 8, 384, 12
    x_long = jax.random.normal(k2, (b2, c2, s2), dtype=jnp.bfloat16)
    ref_long = x_long[:, :, : s2 - ch2]
    out_long = jax.block_until_ready(chomp1d(x_long, ch2, force_pallas=True))
    assert out_long.shape == (b2, c2, s2 - ch2), out_long.shape
    assert jnp.array_equal(out_long, ref_long), "lane-tiled kernel mismatch"

    print("KERNEL_OK")
</pallas_src>

<mosaic_0001>
module attributes {stable_mosaic.version = 11 : i64} {
  func.func @_prefix_kernel(%arg0: i32, %arg1: memref<8x16xf32, #tpu.memory_space<vmem>>, %arg2: memref<8x14xf32, #tpu.memory_space<vmem>>) attributes {dimension_semantics = [#tpu.dimension_semantics<parallel>], iteration_bounds = array<i64: 1>, scalar_prefetch = 0 : i64, scratch_operands = 0 : i64, tpu.core_type = #tpu.core_type<tc>, window_params = [{transform_indices = @transform_0, window_bounds = array<i64: 8, 16>}, {transform_indices = @transform_1, window_bounds = array<i64: 8, 14>}]} {
    %c0 = arith.constant 0 : index
    %c0_0 = arith.constant 0 : index
    %0 = vector.load %arg1[%c0, %c0_0] : memref<8x16xf32, #tpu.memory_space<vmem>>, vector<8x14xf32>
    %c0_1 = arith.constant 0 : index
    %c0_2 = arith.constant 0 : index
    %1 = vector.load %arg2[%c0_1, %c0_2] : memref<8x14xf32, #tpu.memory_space<vmem>>, vector<8x14xf32>
    tpu.vector_store %arg2[%c0_1, %c0_2], %0 {strides = array<i32>} : memref<8x14xf32, #tpu.memory_space<vmem>>, vector<8x14xf32>,
    return
  }
  func.func @transform_0(%arg0: i32) -> (i32, i32) {
    %c0_i32 = arith.constant 0 : i32
    %c0_i32_0 = arith.constant 0 : i32
    return %arg0, %c0_i32 : i32, i32
  }
  func.func @transform_1(%arg0: i32) -> (i32, i32) {
    %c0_i32 = arith.constant 0 : i32
    %c0_i32_0 = arith.constant 0 : i32
    return %arg0, %c0_i32 : i32, i32
  }
}

</mosaic_0001>

<bundles_post_ra>
// kernel: tpu_custom_call.1
= control target key start
LH: loop header
LB: loop body
LE: loop exit
PB: predicated region body
PF: predicated region fallthrough
CT: control target
= control target key end

     0   :  { %6 = vsyncpa [#allocation3], 0  ;;  %s125_s0 = inlined_call_operand.hbm [shape: f32[8,16], index: 0, kind: input, shape index: {}]   ;;  %s126_s1 = inlined_call_operand.hbm [shape: f32[8,14], index: 1, kind: output, shape index: {}]  }
   0x1   :  { %7 = vsyncpa [#allocation4], 0  ;;  %s89_s6 = smov [#allocation2]   ;;  %s41_s10 = scalar_lea.hbm %s125_s0, 128 }
   0x2   :  { %s14_s7 = sshll.u32 %s89_s6, 4  ;;  %p42_p0 = scmp.ne.s32.totalorder %s125_s0, %s41_s10  ;;  %s15_s7 = int_to_ptr.vmem [resolvable:$true] %s14_s7 }
   0x3   :  { %p45_p1 = scmp.lt.u32.totalorder %s41_s10, %s125_s0 }
   0x5   :  { %p47_p2 = pnand %p45_p1, %p42_p0 }
   0x7   :  { %50 = shalt.err (!%p47_p2)
}
   0x8   :  { %s51_s15 = scalar_lea.vmem %s15_s7, 128  ;;  %p56_p4 = scmp.lt.s32.totalorder %s15_s7, %s15_s7 }
   0x9   :  { %p52_p3 = scmp.ne.s32.totalorder %s15_s7, %s51_s15  ;;  %p57_p5 = scmp.lt.s32.totalorder %s51_s15, %s51_s15 }
   0xb   :  { %p58_p6 = por %p57_p5, %p56_p4 }
   0xd   :  { %p59_p7 = pnand %p58_p6, %p52_p3 }
   0xf   :  { %62 = shalt.err (!%p59_p7)
}
  0x10   :  { %17 = dma.hbm_to_vmem [thread:$0]  %s125_s0, 128, %s15_s7, [#allocation3]  }
  0x11   :  { %85 = dma.done.wait [#allocation3], 128  }
  0x12   :  { %86 = vsyncadd [#allocation3], 4294967168  ;;  %s90_s18 = smov [#allocation5]   ;;  %vm22_vm0 = vcmask 113664   ;;  %v21_v0 = vld [vmem:[#allocation2] sm:$0xff] }
  0x13   :  { %s30_s19 = sshll.u32 %s90_s18, 4  ;;  %23 = vst.msk [vmem:[#allocation5] sm:$0xff] %vm22_vm0, %v21_v0  ;;  %s31_s19 = int_to_ptr.vmem [resolvable:$true] %s30_s19 }
  0x14   :  { %s63_s20 = scalar_lea.vmem %s31_s19, 128  ;;  %p68_p9 = scmp.lt.s32.totalorder %s31_s19, %s31_s19 }
  0x15   :  { %p64_p8 = scmp.ne.s32.totalorder %s31_s19, %s63_s20  ;;  %p69_p10 = scmp.lt.s32.totalorder %s63_s20, %s63_s20 }
  0x17   :  { %p70_p11 = por %p69_p10, %p68_p9 }
  0x19   :  { %p71_p12 = pnand %p70_p11, %p64_p8 }
  0x1b   :  { %74 = shalt.err (!%p71_p12)
}
  0x1c   :  { %s75_s23 = scalar_lea.hbm %s126_s1, 128 }
  0x1d   :  { %p76_p13 = scmp.ne.s32.totalorder %s126_s1, %s75_s23  ;;  %p79_p0 = scmp.lt.u32.totalorder %s75_s23, %s126_s1 }
  0x1f   :  { %p81_p1 = pnand %p79_p0, %p76_p13 }
  0x21   :  { %84 = shalt.err (!%p81_p1)
}
  0x22   :  { %33 = dma.vmem_to_hbm [thread:$0]  %s31_s19, 128, %s126_s1, [#allocation4]  }
  0x23   :  { %87 = dma.done.wait [#allocation4], 128  }
  0x24   :  { %88 = vsyncadd [#allocation4], 4294967168 }
  0x25   :  { %37 = vsyncpa [#allocation3], 1 }
  0x26   :  { %38 = vsyncpa [#allocation4], 1 }

</bundles_post_ra>
